<compile_context>
chip_gen: v6e
topology: v6e:2x2x1
jax: 0.10.0
libtpu: 0.0.40
codegen_flags: <defaults>
</compile_context>

<pallas_src>
import math
import jax
import jax.numpy as jnp
from jax.experimental import pallas as pl
from jax.experimental.pallas import tpu as pltpu


def _round_up(x, m):
    return (x + m - 1) // m * m


# --------------------------------------------------------------------------
# Kernels.  Weights arrive PRE-TRANSPOSED from the wrapper:
#   wu_t : (n2, D)  ( = Linear(n2, D).weight.T )
#   wd_t : (D, n2)  ( = Linear(D, n2).weight.T )
# so both matmuls are canonical last-dim x first-dim contractions -> no
# per-grid-step weight transpose inside the kernel body.
# --------------------------------------------------------------------------
def _routing_kernel_l_gt_0(state_ref, p_ref, wu_t_ref, wd_t_ref, out_ref):
    in_dtype = state_ref.dtype
    # u = p_l @ W_u^T  -> (TB, D), f32 accumulation on the MXU.
    u = jnp.dot(p_ref[...], wu_t_ref[...], preferred_element_type=jnp.float32)
    # Gate + ReLU in f32 on the (TB, D) intermediate.
    x = jnp.maximum(u * state_ref[...].astype(jnp.float32), 0.0)
    # Feed the second MXU matmul in the input dtype (bf16-friendly), f32 acc.
    x = x.astype(in_dtype)
    out = jnp.dot(x, wd_t_ref[...], preferred_element_type=jnp.float32)
    out_ref[...] = out.astype(out_ref.dtype)


def _routing_kernel_l_eq_0(state_ref, wd_t_ref, out_ref):
    x = jnp.maximum(state_ref[...], jnp.zeros((), state_ref.dtype))
    out = jnp.dot(x, wd_t_ref[...], preferred_element_type=jnp.float32)
    out_ref[...] = out.astype(out_ref.dtype)


# --------------------------------------------------------------------------
# Wrapper.
# --------------------------------------------------------------------------
def routing_layer_forward(state_mul_task, p_l, w_u, w_d, l):
    """Pallas implementation of RoutingLayer.forward.

    state_mul_task : (BS, D)
    p_l            : (BS, n^2) or None (when l == 0)
    w_u            : (D, n^2) torch-layout weight of Linear(n2, D) (unused if l == 0)
    w_d            : (n^2, D) torch-layout weight of Linear(D, n2)
    """
    bs, d = state_mul_task.shape
    n2 = w_d.shape[0]
    dtype = state_mul_task.dtype
    itemsize = jnp.dtype(dtype).itemsize
    # Sublane multiple is dtype dependent: f32 -> 8, bf16 -> 16, int8/fp8 -> 32.
    sublane = 8 * max(1, 4 // itemsize)

    # ---- generation-aware VMEM budget (v7x: 64 MiB / TC, v5e/v6e: 128 MiB).
    try:
        vmem_cap = int(pltpu.get_tpu_info().vmem_capacity_bytes)
    except Exception:
        vmem_cap = 64 << 20
    vmem_budget = int(vmem_cap * 0.70)

    w_itemsize = jnp.dtype(w_d.dtype).itemsize
    weight_bytes = w_d.size * w_itemsize
    if l > 0:
        weight_bytes += w_u.size * jnp.dtype(w_u.dtype).itemsize

    bytes_per_row = (d + n2 + (n2 if l > 0 else 0)) * itemsize

    def _est_vmem(tile):
        # Every BlockSpec (weights included) is double-buffered by the pipeline;
        # also count the f32 intermediates (u / gated x and pre-cast output).
        act = 2 * tile * bytes_per_row
        interm = tile * (d + n2) * 4
        return 2 * weight_bytes + act + interm

    # ---- batch tile from a bytes-per-step target (~4 MiB) so the ~0.35 us
    # per-step pipeline overhead is amortized; keep >= 4 grid steps alive so
    # the parallel axis shards across v7x's 2 TensorCores and DMA overlaps.
    tb = max(sublane, (4 << 20) // max(bytes_per_row, 1))
    tb = min(tb, max(sublane, _round_up(pl.cdiv(bs, 4), sublane)))
    tb = min(tb, _round_up(bs, sublane))
    tb = _round_up(tb, sublane)
    while tb > sublane and _est_vmem(tb) > vmem_budget:
        tb = _round_up(max(sublane, tb // 2), sublane)

    vmem_limit = None
    est = _est_vmem(tb)
    if est > (16 << 20):
        vmem_limit = min(_round_up(int(est * 1.5), 1 << 20), int(vmem_cap * 0.9))

    grid = (pl.cdiv(bs, tb),)
    out_shape = jax.ShapeDtypeStruct((bs, n2), dtype)
    out_spec = pl.BlockSpec((tb, n2), lambda i: (i, 0))
    compiler_params = pltpu.CompilerParams(
        dimension_semantics=("parallel",),
        vmem_limit_bytes=vmem_limit,
    )

    # TODO(synk): at production sizes, pad n2 (and ideally D) to lane multiples
    # of 128 -- or fuse several routing layers / heads into one (BS, k*n2)
    # output slab -- so stores are unmasked lane-dense vst; at demo sizes
    # (n2=16, D=32) the full-array block is used and this is moot.

    if l > 0:
        assert p_l is not None
        wu_t = w_u.T    # (n2, D): one-time wrapper transpose, amortized.
        wd_t = w_d.T    # (D, n2)
        flops = 4 * bs * d * n2  # two matmuls, 2 flops/MAC
        bytes_accessed = ((state_mul_task.size + p_l.size + bs * n2) * itemsize
                          + weight_bytes)
        out = pl.pallas_call(
            _routing_kernel_l_gt_0,
            out_shape=out_shape,
            grid=grid,
            in_specs=[
                pl.BlockSpec((tb, d), lambda i: (i, 0)),    # state tile
                pl.BlockSpec((tb, n2), lambda i: (i, 0)),   # p_l tile
                pl.BlockSpec((n2, d), lambda i: (0, 0)),    # wu_t, VMEM-resident
                pl.BlockSpec((d, n2), lambda i: (0, 0)),    # wd_t, VMEM-resident
            ],
            out_specs=out_spec,
            compiler_params=compiler_params,
            cost_estimate=pl.CostEstimate(flops=flops, transcendentals=0,
                                          bytes_accessed=bytes_accessed),
        )(state_mul_task, p_l, wu_t, wd_t)
    else:
        wd_t = w_d.T
        flops = 2 * bs * d * n2
        bytes_accessed = ((state_mul_task.size + bs * n2) * itemsize
                          + weight_bytes)
        out = pl.pallas_call(
            _routing_kernel_l_eq_0,
            out_shape=out_shape,
            grid=grid,
            in_specs=[
                pl.BlockSpec((tb, d), lambda i: (i, 0)),    # state tile
                pl.BlockSpec((d, n2), lambda i: (0, 0)),    # wd_t, VMEM-resident
            ],
            out_specs=out_spec,
            compiler_params=compiler_params,
            cost_estimate=pl.CostEstimate(flops=flops, transcendentals=0,
                                          bytes_accessed=bytes_accessed),
        )(state_mul_task, wd_t)

    return out


def _kaiming_uniform(key, shape, fan_in):
    # Mimics torch.nn.Linear default init (kaiming_uniform_ with a=sqrt(5)):
    # bound = 1 / sqrt(fan_in)
    bound = 1.0 / math.sqrt(fan_in)
    return jax.random.uniform(key, shape, minval=-bound, maxval=bound,
                              dtype=jnp.float32)


if __name__ == "__main__":
    # Small, module-consistent shapes.
    BS, D, N = 8, 32, 4
    N2 = N * N

    key = jax.random.PRNGKey(0)
    k1, k2, k3, k4 = jax.random.split(key, 4)

    state_mul_task = jax.random.normal(k1, (BS, D), dtype=jnp.float32)
    p_l = jax.random.normal(k2, (BS, N2), dtype=jnp.float32)

    # Parameters (deterministic, torch-Linear-shaped):
    w_u = _kaiming_uniform(k3, (D, N2), fan_in=N2)  # Linear(n2, D).weight
    w_d = _kaiming_uniform(k4, (N2, D), fan_in=D)   # Linear(D, n2).weight

    # l > 0 path: both linears + elementwise gate.
    out1 = jax.block_until_ready(
        routing_layer_forward(state_mul_task, p_l, w_u, w_d, l=1))
    ref1 = jnp.maximum((p_l @ w_u.T) * state_mul_task, 0.0) @ w_d.T
    assert out1.shape == (BS, N2)
    assert jnp.allclose(out1, ref1, atol=1e-5, rtol=1e-5)

    # l == 0 path: relu + down projection only.
    out0 = jax.block_until_ready(
        routing_layer_forward(state_mul_task, None, None, w_d, l=0))
    ref0 = jnp.maximum(state_mul_task, 0.0) @ w_d.T
    assert out0.shape == (BS, N2)
    assert jnp.allclose(out0, ref0, atol=1e-5, rtol=1e-5)

    # Non-tile-multiple batch exercises the unpadded / masked last block path.
    BS2 = 13
    k5, k6 = jax.random.split(k1, 2)
    state2 = jax.random.normal(k5, (BS2, D), dtype=jnp.float32)
    p2 = jax.random.normal(k6, (BS2, N2), dtype=jnp.float32)
    out2 = jax.block_until_ready(
        routing_layer_forward(state2, p2, w_u, w_d, l=2))
    ref2 = jnp.maximum((p2 @ w_u.T) * state2, 0.0) @ w_d.T
    assert out2.shape == (BS2, N2)
    assert jnp.allclose(out2, ref2, atol=1e-5, rtol=1e-5)

    print("KERNEL_OK")
</pallas_src>

<mosaic_0001>
module attributes {stable_mosaic.version = 11 : i64} {
  func.func @_routing_kernel_l_gt_0(%arg0: i32, %arg1: memref<8x32xf32, #tpu.memory_space<vmem>>, %arg2: memref<8x16xf32, #tpu.memory_space<vmem>>, %arg3: memref<16x32xf32, #tpu.memory_space<vmem>>, %arg4: memref<32x16xf32, #tpu.memory_space<vmem>>, %arg5: memref<8x16xf32, #tpu.memory_space<vmem>>) attributes {dimension_semantics = [#tpu.dimension_semantics<parallel>], iteration_bounds = array<i64: 1>, scalar_prefetch = 0 : i64, scratch_operands = 0 : i64, tpu.core_type = #tpu.core_type<tc>, window_params = [{transform_indices = @transform_0, window_bounds = array<i64: 8, 32>}, {transform_indices = @transform_1, window_bounds = array<i64: 8, 16>}, {pipeline_mode = #tpu.pipeline_mode<synchronous>, transform_indices = @transform_2, window_bounds = array<i64: 16, 32>}, {pipeline_mode = #tpu.pipeline_mode<synchronous>, transform_indices = @transform_3, window_bounds = array<i64: 32, 16>}, {transform_indices = @transform_4, window_bounds = array<i64: 8, 16>}]} {
    %c0 = arith.constant 0 : index
    %c0_0 = arith.constant 0 : index
    %0 = vector.load %arg2[%c0, %c0_0] : memref<8x16xf32, #tpu.memory_space<vmem>>, vector<8x16xf32>
    %c0_1 = arith.constant 0 : index
    %c0_2 = arith.constant 0 : index
    %1 = vector.load %arg3[%c0_1, %c0_2] : memref<16x32xf32, #tpu.memory_space<vmem>>, vector<16x32xf32>
    %cst = arith.constant dense<0.000000e+00> : vector<8x32xf32>
    %2 = tpu.matmul %0, %1, %cst {dimension_numbers = #tpu.dot_dimension_numbers<[1], [0], [0], [1], [0, 0, 1, 1], [], []>} : vector<8x16xf32>, vector<16x32xf32>, vector<8x32xf32> -> vector<8x32xf32>
    %c0_3 = arith.constant 0 : index
    %c0_4 = arith.constant 0 : index
    %3 = vector.load %arg1[%c0_3, %c0_4] : memref<8x32xf32, #tpu.memory_space<vmem>>, vector<8x32xf32>
    %4 = arith.mulf %2, %3 : vector<8x32xf32>
    %cst_5 = arith.constant 0.000000e+00 : f32
    %5 = vector.broadcast %cst_5 : f32 to vector<8x32xf32>
    %6 = arith.maximumf %4, %5 : vector<8x32xf32>
    %c0_6 = arith.constant 0 : index
    %c0_7 = arith.constant 0 : index
    %7 = vector.load %arg4[%c0_6, %c0_7] : memref<32x16xf32, #tpu.memory_space<vmem>>, vector<32x16xf32>
    %cst_8 = arith.constant dense<0.000000e+00> : vector<8x16xf32>
    %8 = tpu.matmul %6, %7, %cst_8 {dimension_numbers = #tpu.dot_dimension_numbers<[1], [0], [0], [1], [0, 0, 1, 1], [], []>} : vector<8x32xf32>, vector<32x16xf32>, vector<8x16xf32> -> vector<8x16xf32>
    %c0_9 = arith.constant 0 : index
    %c0_10 = arith.constant 0 : index
    %9 = vector.load %arg5[%c0_9, %c0_10] : memref<8x16xf32, #tpu.memory_space<vmem>>, vector<8x16xf32>
    tpu.vector_store %arg5[%c0_9, %c0_10], %8 {strides = array<i32>} : memref<8x16xf32, #tpu.memory_space<vmem>>, vector<8x16xf32>,
    return
  }
  func.func @transform_0(%arg0: i32) -> (i32, i32) {
    %c0_i32 = arith.constant 0 : i32
    %c0_i32_0 = arith.constant 0 : i32
    return %arg0, %c0_i32 : i32, i32
  }
  func.func @transform_1(%arg0: i32) -> (i32, i32) {
    %c0_i32 = arith.constant 0 : i32
    %c0_i32_0 = arith.constant 0 : i32
    return %arg0, %c0_i32 : i32, i32
  }
  func.func @transform_2(%arg0: i32) -> (i32, i32) {
    %c0_i32 = arith.constant 0 : i32
    %c0_i32_0 = arith.constant 0 : i32
    %c0_i32_1 = arith.constant 0 : i32
    return %c0_i32, %c0_i32_0 : i32, i32
  }
  func.func @transform_3(%arg0: i32) -> (i32, i32) {
    %c0_i32 = arith.constant 0 : i32
    %c0_i32_0 = arith.constant 0 : i32
    %c0_i32_1 = arith.constant 0 : i32
    return %c0_i32, %c0_i32_0 : i32, i32
  }
  func.func @transform_4(%arg0: i32) -> (i32, i32) {
    %c0_i32 = arith.constant 0 : i32
    %c0_i32_0 = arith.constant 0 : i32
    return %arg0, %c0_i32 : i32, i32
  }
}

</mosaic_0001>

<bundles_post_ra>
// kernel: tpu_custom_call.1
= control target key start
LH: loop header
LB: loop body
LE: loop exit
PB: predicated region body
PF: predicated region fallthrough
CT: control target
= control target key end

     0   :  { %v244_v1 = vmov 0.0   ;;  %vm245_vm0 = vmmov 0   ;;  %s301_s0 = inlined_call_operand.vmem [shape: f32[8,32], index: 0, kind: input, shape index: {}]   ;;  %s302_s1 = inlined_call_operand.vmem [shape: f32[8,16], index: 1, kind: input, shape index: {}]   ;;  %s303_s2 = inlined_call_operand.vmem [shape: f32[16,32], index: 2, kind: input, shape index: {}]   ;;  %s304_s3 = inlined_call_operand.vmem [shape: f32[32,16], index: 3, kind: input, shape index: {}]   ;;  %s305_s4 = inlined_call_operand.hbm [shape: f32[8,16], index: 4, kind: output, shape index: {}]  }
   0x1   :  { %v20_v0 = vld [vmem:[%s303_s2 + $0x8] sm:$0xff]  ;;  %201 = vmatprep.subr.mxu0 %v244_v1  ;;  %v19_v2 = vld [vmem:[%s303_s2] sm:$0xff]  ;;  %205 = vmatprep.mubr.msk.f32.mxu0 %vm245_vm0, %v244_v1  ;;  %v101_v3 = vld [vmem:[%s304_s3 + $0x18] sm:$0xff] }
   0x2   :  { %9 = vsyncpa [#allocation3], 0  ;;  %202 = vmatpush3.msra.mxu0 %v20_v0  ;;  %v18_v4 = vld [vmem:[%s302_s1] sm:$0xff]  ;;  %vm21_vm1 = vcmask 130048   ;;  %208 = vmatprep.subr.mxu1 %v244_v1  ;;  %v100_v5 = vld [vmem:[%s304_s3 + $0x10] sm:$0xff]  ;;  %vm102_vm2 = vcmask 261120  }
   0x3   :  { %203 = vmatprep.subr.mxu0 %v244_v1  ;;  %209 = vmatpush3.msra.mxu1 %v101_v3  ;;  %v99_v6 = vld [vmem:[%s304_s3 + $0x8] sm:$0xff]  ;;  %v98_v7 = vld [vmem:[%s304_s3] sm:$0xff]  ;;  %s246_s29 = smov [#allocation2]  }
   0x4   :  { %204 = vmatpush3.msra.mxu0 %v19_v2  ;;  %210 = vmatprep.subr.mxu1 %v244_v1  ;;  %v95_v8 = vld [vmem:[%s301_s0] sm:$0xff]  ;;  %s183_s30 = sshll.u32 %s246_s29, 4  ;;  %s184_s30 = int_to_ptr.vmem [resolvable:$true] %s183_s30 }
   0x5   :  { %206 = vmatmul.mubr.msk.f32.vlgmr.msra.gmra.mxu0 %vm21_vm1, %v18_v4  ;;  %216 = vmatprep.mubr.msk.f32.mxu1 %vm245_vm0, %v244_v1  ;;  %s222_s5 = scalar_lea.vmem %s184_s30, 128  ;;  %p227_p1 = scmp.lt.s32.totalorder %s184_s30, %s184_s30 }
   0x6   :  { %211 = vmatpush3.msra.mxu1 %v100_v5  ;;  %p223_p0 = scmp.ne.s32.totalorder %s184_s30, %s222_s5  ;;  %p228_p2 = scmp.lt.s32.totalorder %s222_s5, %s222_s5 }
   0x7   :  { %212 = vmatprep.subr.mxu1 %v244_v1 }
   0x8   :  { %213 = vmatpush3.msra.mxu1 %v99_v6  ;;  %p229_p3 = por %p228_p2, %p227_p1 }
   0x9   :  { %214 = vmatprep.subr.mxu1 %v244_v1 }
   0xa   :  { %215 = vmatpush3.msra.mxu1 %v98_v7  ;;  %p230_p4 = pnand %p229_p3, %p223_p0 }
  0xc5   :  { %v91_v9 = vpop.f32.mrf.mxu0 }
  0xc6   :  { %v96_v10 = vmul.f32 %v95_v8, %v91_v9 }
  0xc7   :  { %v207_v11 = vpop.f32.mrf.mxu0 }
  0xc8   :  { %v97_v12 = vmax.f32 %v96_v10, 0.0 }
  0xca   :  { %217 = vmatmul.mubr.msk.f32.vlgmr.msra.gmra.mxu1 %vm102_vm2, %v97_v12 }
 0x18a   :  { %v172_v13 = vpop.f32.mrf.mxu1 }
 0x18b   :  { %176 = vst.msk [vmem:[#allocation2] sm:$0xff] %vm21_vm1, %v172_v13 }
 0x18c   :  { %v218_v14 = vpop.f32.mrf.mxu1 }
 0x18d   :  { %233 = shalt.err (!%p230_p4)
}
 0x18e   :  { %186 = dma.vmem_to_hbm [thread:$0]  %s184_s30, 128, %s305_s4, [#allocation3]  }
 0x18f   :  { %242 = dma.done.wait [#allocation3], 128  }
 0x190   :  { %243 = vsyncadd [#allocation3], 4294967168 }
 0x191   :  { %190 = vsyncpa [#allocation3], 1 }

</bundles_post_ra>
